<compile_context>
chip_gen: v6e
topology: v6e:2x2x1
jax: 0.10.0
libtpu: 0.0.40
codegen_flags: <defaults>
</compile_context>

<pallas_src>
import functools

import jax
import jax.numpy as jnp
from jax import lax
from jax.experimental import pallas as pl
from jax.experimental.pallas import tpu as pltpu

DELTA = 0.7
GAMMA = 0.75
EPSILON = 1e-7

_TARGET_TILE_BYTES = 2 * 1024 * 1024  # physical VMEM per input per pipeline buffer


def _round_up(x, m):
    return (x + m - 1) // m * m


def _choose_blocks(nr, hw, itemsize):
    """Jointly pick (rows_per_block, lanes_per_block) for the (nr, hw) layout."""
    nc_block = nr if nr <= 8 else 8
    rows_eff = _round_up(nc_block, 8)          # VMEM rounds sublanes up to 8
    max_elems = max(_TARGET_TILE_BYTES // max(int(itemsize), 1), rows_eff * 128)
    fit_lanes = max(128, (max_elems // rows_eff) // 128 * 128)
    if fit_lanes >= hw:
        tile_hw = hw                            # full spatial extent on lanes
        if nr > 8:
            # Small-HW / large-NC regime: grow the sublane block instead.
            lanes_pad = _round_up(hw, 128)
            nb = max(8, (max_elems // lanes_pad) // 8 * 8)
            nb = min(nb, max(8, (nr // 8) * 8))
            if nr > 16 and pl.cdiv(nr, nb) < 2:
                # keep >= 2 blocks on the parallel (row) axis for megacore
                nb = max(8, _round_up(pl.cdiv(nr, 2), 8))
            nc_block = nb
    else:
        tile_hw = fit_lanes                     # multiple of 128, tiled by grid
    return int(nc_block), int(tile_hw)


def _fold128(x):
    """(rows, L) with L % 128 == 0 -> (rows, 128) lane-wise partial sums.

    Pure vreg-aligned slices + VPU adds (balanced tree); no XLU cross-lane
    reduce and no relayout.  The final 128-lane reduce is done in the epilogue.
    """
    rows, L = x.shape
    parts = [x[:, i * 128:(i + 1) * 128] for i in range(L // 128)]
    while len(parts) > 1:
        nxt = [parts[i] + parts[i + 1] for i in range(0, len(parts) - 1, 2)]
        if len(parts) % 2:
            nxt.append(parts[-1])
        parts = nxt
    return parts[0]


def _partial_sum_kernel(yp_ref, yt_ref, tp_ref, syt_ref, syp_ref, *,
                        k_per_seg, last_tile, valid_last, needs_mask, acc_width):
    """Accumulate per-row partial sums over the spatial grid axis.

    yp_ref / yt_ref              : (nc_block, tile_hw) input tiles (native dtype).
    tp_ref / syt_ref / syp_ref   : (nc_block, acc_width) f32 accumulators,
                                   resident across the (arbitrary) spatial axis.
    """
    s = pl.program_id(0)
    k = pl.program_id(2)

    @pl.when(k == 0)
    def _init():
        tp_ref[...] = jnp.zeros_like(tp_ref)
        syt_ref[...] = jnp.zeros_like(syt_ref)
        syp_ref[...] = jnp.zeros_like(syp_ref)

    yp = jnp.clip(yp_ref[...].astype(jnp.float32), EPSILON, 1.0 - EPSILON)
    yt = yt_ref[...].astype(jnp.float32)

    if acc_width == 1:
        reduce_fn = lambda v: jnp.sum(v, axis=-1, keepdims=True)
    else:
        reduce_fn = _fold128

    def accumulate(yp_v, yt_v):
        tp_ref[...] += reduce_fn(yt_v * yp_v)
        syt_ref[...] += reduce_fn(yt_v)
        syp_ref[...] += reduce_fn(yp_v)

    if needs_mask:
        kg = s * k_per_seg + k            # global spatial tile index

        @pl.when(kg == last_tile)         # ragged edge: mask off the hot path
        def _edge():
            lane = lax.broadcasted_iota(jnp.int32, yp.shape, 1)
            m = lane < valid_last
            accumulate(jnp.where(m, yp, 0.0), jnp.where(m, yt, 0.0))

        @pl.when(kg != last_tile)
        def _steady():
            accumulate(yp, yt)
    else:
        accumulate(yp, yt)


def symmetric_focal_tversky_loss(y_pred, y_true):
    """Forward pass of SymmetricFocalTverskyLoss.

    y_pred, y_true: (N, C, H, W) with C >= 2 (background = class 0,
    foreground = class 1), NCHW layout like the PyTorch module.
    """
    assert y_pred.shape == y_true.shape and y_pred.ndim == 4
    n, c, h, w = y_pred.shape
    assert c >= 2, "SymmetricFocalTverskyLoss uses class indices 0 and 1"
    nc, hw = n * c, h * w

    # Use spare sublanes when N*C < 8 by splitting each row into g chunks
    # (free row-major reshape; per-row sums are re-merged in the epilogue).
    g = 1
    if nc < 8:
        for cand in range(8 // nc, 0, -1):
            if hw % cand == 0:
                g = cand
                break
    nr, hw2 = nc * g, hw // g

    yp = y_pred.reshape(nr, hw2)
    yt = y_true.reshape(nr, hw2)

    itemsize = jnp.dtype(y_pred.dtype).itemsize
    nc_block, tile_hw = _choose_blocks(nr, hw2, itemsize)

    nc_blocks = pl.cdiv(nr, nc_block)
    total_k = pl.cdiv(hw2, tile_hw)

    # Leading parallel axis so v7x's second TensorCore has work when the row
    # axis has a single block; harmless (size 1) otherwise.
    num_segments = 2 if (nc_blocks == 1 and total_k >= 2 and total_k % 2 == 0) else 1
    k_per_seg = total_k // num_segments

    needs_mask = (hw2 % tile_hw) != 0
    last_tile = total_k - 1
    valid_last = hw2 - last_tile * tile_hw
    acc_width = 128 if (tile_hw % 128 == 0) else 1

    in_spec = pl.BlockSpec((nc_block, tile_hw),
                           lambda s, b, k: (b, s * k_per_seg + k))
    acc_spec = pl.BlockSpec((None, nc_block, acc_width),
                            lambda s, b, k: (s, b, 0))

    kernel = functools.partial(
        _partial_sum_kernel, k_per_seg=k_per_seg, last_tile=last_tile,
        valid_last=valid_last, needs_mask=needs_mask, acc_width=acc_width)

    # Size the scoped-VMEM request to the actual working set (<= 32 MiB: safe
    # on v7x's 64 MiB physical, not over-requested on v5e/v6e).
    rows_eff = _round_up(nc_block, 8)
    in_tile = rows_eff * tile_hw * int(itemsize)
    f32_tile = rows_eff * tile_hw * 4
    est = 2 * 2 * in_tile + 4 * f32_tile + 6 * rows_eff * 128 * 4 + (1 << 20)
    vmem_limit = int(min(32 << 20, max(16 << 20, _round_up(est, 1 << 20))))

    tp, s_yt, s_yp = pl.pallas_call(
        kernel,
        out_shape=[jax.ShapeDtypeStruct((num_segments, nr, acc_width),
                                        jnp.float32)] * 3,
        grid=(num_segments, nc_blocks, k_per_seg),
        in_specs=[in_spec, in_spec],
        out_specs=[acc_spec, acc_spec, acc_spec],
        compiler_params=pltpu.CompilerParams(
            dimension_semantics=("parallel", "parallel", "arbitrary"),
            vmem_limit_bytes=vmem_limit,
        ),
    )(yp, yt)

    # Tiny O(N*C) epilogue in plain JAX.
    def per_class(x):
        return x.sum(axis=(0, 2)).reshape(nc, g).sum(axis=1).reshape(n, c)

    tp = per_class(tp)
    s_yt = per_class(s_yt)
    s_yp = per_class(s_yp)
    fn = s_yt - tp
    fp = s_yp - tp
    dice = (tp + EPSILON) / (tp + DELTA * fn + (1.0 - DELTA) * fp + EPSILON)
    back = (1.0 - dice[:, 0]) * jnp.power(1.0 - dice[:, 0], -GAMMA)
    fore = (1.0 - dice[:, 1]) * jnp.power(1.0 - dice[:, 1], -GAMMA)
    return jnp.mean(jnp.stack([back, fore], axis=-1))


def _reference(y_pred, y_true):
    """Direct transcription of the PyTorch module (for verification)."""
    yp = jnp.clip(y_pred.astype(jnp.float32), EPSILON, 1.0 - EPSILON)
    yt = y_true.astype(jnp.float32)
    tp = jnp.sum(yt * yp, axis=(2, 3))
    fn = jnp.sum(yt * (1.0 - yp), axis=(2, 3))
    fp = jnp.sum((1.0 - yt) * yp, axis=(2, 3))
    dice = (tp + EPSILON) / (tp + DELTA * fn + (1.0 - DELTA) * fp + EPSILON)
    back = (1.0 - dice[:, 0]) * jnp.power(1.0 - dice[:, 0], -GAMMA)
    fore = (1.0 - dice[:, 1]) * jnp.power(1.0 - dice[:, 1], -GAMMA)
    return jnp.mean(jnp.stack([back, fore], axis=-1))


if __name__ == "__main__":
    # Binary segmentation: N=2, C=2 (background, foreground), 16x16 spatial.
    key = jax.random.PRNGKey(0)
    k1, k2 = jax.random.split(key)
    logits = jax.random.normal(k1, (2, 2, 16, 16), dtype=jnp.float32)
    y_pred = jax.nn.softmax(logits, axis=1)                        # probs over C
    labels = jax.random.bernoulli(k2, 0.5, (2, 16, 16)).astype(jnp.int32)
    y_true = jax.nn.one_hot(labels, 2, axis=1, dtype=jnp.float32)  # (2,2,16,16)

    loss = jax.block_until_ready(symmetric_focal_tversky_loss(y_pred, y_true))
    ref = jax.block_until_ready(_reference(y_pred, y_true))
    assert jnp.allclose(loss, ref, atol=1e-5, rtol=1e-5), (loss, ref)

    print("KERNEL_OK")
</pallas_src>

<mosaic_0001>
module attributes {stable_mosaic.version = 11 : i64} {
  func.func @_partial_sum_kernel(%arg0: i32, %arg1: i32, %arg2: i32, %arg3: memref<8x128xf32, #tpu.memory_space<vmem>>, %arg4: memref<8x128xf32, #tpu.memory_space<vmem>>, %arg5: memref<1x8x128xf32, #tpu.memory_space<vmem>>, %arg6: memref<1x8x128xf32, #tpu.memory_space<vmem>>, %arg7: memref<1x8x128xf32, #tpu.memory_space<vmem>>) attributes {dimension_semantics = [#tpu.dimension_semantics<parallel>, #tpu.dimension_semantics<parallel>, #tpu.dimension_semantics<arbitrary>], iteration_bounds = array<i64: 1, 1, 1>, scalar_prefetch = 0 : i64, scratch_operands = 0 : i64, tpu.core_type = #tpu.core_type<tc>, window_params = [{transform_indices = @transform_0, window_bounds = array<i64: 8, 128>}, {transform_indices = @transform_1, window_bounds = array<i64: 8, 128>}, {transform_indices = @transform_2, window_bounds = array<i64: 1, 8, 128>}, {transform_indices = @transform_3, window_bounds = array<i64: 1, 8, 128>}, {transform_indices = @transform_4, window_bounds = array<i64: 1, 8, 128>}]} {
    %c0_i32 = arith.constant 0 : i32
    %0 = arith.cmpi eq, %arg2, %c0_i32 : i32
    %1 = arith.extui %0 : i1 to i32
    %c0_i32_0 = arith.constant 0 : i32
    %2 = arith.cmpi ne, %1, %c0_i32_0 : i32
    scf.if %2 {
      %cst_23 = arith.constant 0.000000e+00 : f32
      %28 = vector.broadcast %cst_23 : f32 to vector<8x128xf32>
      %c0_24 = arith.constant 0 : index
      %c0_25 = arith.constant 0 : index
      %c0_26 = arith.constant 0 : index
      %29 = vector.load %arg5[%c0_24, %c0_25, %c0_26] : memref<1x8x128xf32, #tpu.memory_space<vmem>>, vector<1x8x128xf32>
      %30 = vector.shape_cast %29 : vector<1x8x128xf32> to vector<8x128xf32>
      %31 = vector.shape_cast %28 : vector<8x128xf32> to vector<1x8x128xf32>
      tpu.vector_store %arg5[%c0_24, %c0_25, %c0_26], %31 {strides = array<i32>} : memref<1x8x128xf32, #tpu.memory_space<vmem>>, vector<1x8x128xf32>,
      %cst_27 = arith.constant 0.000000e+00 : f32
      %32 = vector.broadcast %cst_27 : f32 to vector<8x128xf32>
      %c0_28 = arith.constant 0 : index
      %c0_29 = arith.constant 0 : index
      %c0_30 = arith.constant 0 : index
      %33 = vector.load %arg6[%c0_28, %c0_29, %c0_30] : memref<1x8x128xf32, #tpu.memory_space<vmem>>, vector<1x8x128xf32>
      %34 = vector.shape_cast %33 : vector<1x8x128xf32> to vector<8x128xf32>
      %35 = vector.shape_cast %32 : vector<8x128xf32> to vector<1x8x128xf32>
      tpu.vector_store %arg6[%c0_28, %c0_29, %c0_30], %35 {strides = array<i32>} : memref<1x8x128xf32, #tpu.memory_space<vmem>>, vector<1x8x128xf32>,
      %cst_31 = arith.constant 0.000000e+00 : f32
      %36 = vector.broadcast %cst_31 : f32 to vector<8x128xf32>
      %c0_32 = arith.constant 0 : index
      %c0_33 = arith.constant 0 : index
      %c0_34 = arith.constant 0 : index
      %37 = vector.load %arg7[%c0_32, %c0_33, %c0_34] : memref<1x8x128xf32, #tpu.memory_space<vmem>>, vector<1x8x128xf32>
      %38 = vector.shape_cast %37 : vector<1x8x128xf32> to vector<8x128xf32>
      %39 = vector.shape_cast %36 : vector<8x128xf32> to vector<1x8x128xf32>
      tpu.vector_store %arg7[%c0_32, %c0_33, %c0_34], %39 {strides = array<i32>} : memref<1x8x128xf32, #tpu.memory_space<vmem>>, vector<1x8x128xf32>,
    } else {
    }
    %c0 = arith.constant 0 : index
    %c0_1 = arith.constant 0 : index
    %3 = vector.load %arg3[%c0, %c0_1] : memref<8x128xf32, #tpu.memory_space<vmem>>, vector<8x128xf32>
    %cst = arith.constant 1.000000e-07 : f32
    %cst_2 = arith.constant 0.99999988 : f32
    %4 = vector.broadcast %cst : f32 to vector<8x128xf32>
    %5 = arith.maximumf %4, %3 : vector<8x128xf32>
    %6 = vector.broadcast %cst_2 : f32 to vector<8x128xf32>
    %7 = arith.minimumf %6, %5 : vector<8x128xf32>
    %c0_3 = arith.constant 0 : index
    %c0_4 = arith.constant 0 : index
    %8 = vector.load %arg4[%c0_3, %c0_4] : memref<8x128xf32, #tpu.memory_space<vmem>>, vector<8x128xf32>
    %c0_5 = arith.constant 0 : index
    %c0_6 = arith.constant 0 : index
    %c0_7 = arith.constant 0 : index
    %9 = vector.load %arg5[%c0_5, %c0_6, %c0_7] : memref<1x8x128xf32, #tpu.memory_space<vmem>>, vector<1x8x128xf32>
    %10 = vector.shape_cast %9 : vector<1x8x128xf32> to vector<8x128xf32>
    %11 = arith.mulf %8, %7 : vector<8x128xf32>
    %12 = arith.addf %10, %11 : vector<8x128xf32>
    %c0_8 = arith.constant 0 : index
    %c0_9 = arith.constant 0 : index
    %c0_10 = arith.constant 0 : index
    %13 = vector.load %arg5[%c0_8, %c0_9, %c0_10] : memref<1x8x128xf32, #tpu.memory_space<vmem>>, vector<1x8x128xf32>
    %14 = vector.shape_cast %13 : vector<1x8x128xf32> to vector<8x128xf32>
    %15 = vector.shape_cast %12 : vector<8x128xf32> to vector<1x8x128xf32>
    tpu.vector_store %arg5[%c0_8, %c0_9, %c0_10], %15 {strides = array<i32>} : memref<1x8x128xf32, #tpu.memory_space<vmem>>, vector<1x8x128xf32>,
    %c0_11 = arith.constant 0 : index
    %c0_12 = arith.constant 0 : index
    %c0_13 = arith.constant 0 : index
    %16 = vector.load %arg6[%c0_11, %c0_12, %c0_13] : memref<1x8x128xf32, #tpu.memory_space<vmem>>, vector<1x8x128xf32>
    %17 = vector.shape_cast %16 : vector<1x8x128xf32> to vector<8x128xf32>
    %18 = arith.addf %17, %8 : vector<8x128xf32>
    %c0_14 = arith.constant 0 : index
    %c0_15 = arith.constant 0 : index
    %c0_16 = arith.constant 0 : index
    %19 = vector.load %arg6[%c0_14, %c0_15, %c0_16] : memref<1x8x128xf32, #tpu.memory_space<vmem>>, vector<1x8x128xf32>
    %20 = vector.shape_cast %19 : vector<1x8x128xf32> to vector<8x128xf32>
    %21 = vector.shape_cast %18 : vector<8x128xf32> to vector<1x8x128xf32>
    tpu.vector_store %arg6[%c0_14, %c0_15, %c0_16], %21 {strides = array<i32>} : memref<1x8x128xf32, #tpu.memory_space<vmem>>, vector<1x8x128xf32>,
    %c0_17 = arith.constant 0 : index
    %c0_18 = arith.constant 0 : index
    %c0_19 = arith.constant 0 : index
    %22 = vector.load %arg7[%c0_17, %c0_18, %c0_19] : memref<1x8x128xf32, #tpu.memory_space<vmem>>, vector<1x8x128xf32>
    %23 = vector.shape_cast %22 : vector<1x8x128xf32> to vector<8x128xf32>
    %24 = arith.addf %23, %7 : vector<8x128xf32>
    %c0_20 = arith.constant 0 : index
    %c0_21 = arith.constant 0 : index
    %c0_22 = arith.constant 0 : index
    %25 = vector.load %arg7[%c0_20, %c0_21, %c0_22] : memref<1x8x128xf32, #tpu.memory_space<vmem>>, vector<1x8x128xf32>
    %26 = vector.shape_cast %25 : vector<1x8x128xf32> to vector<8x128xf32>
    %27 = vector.shape_cast %24 : vector<8x128xf32> to vector<1x8x128xf32>
    tpu.vector_store %arg7[%c0_20, %c0_21, %c0_22], %27 {strides = array<i32>} : memref<1x8x128xf32, #tpu.memory_space<vmem>>, vector<1x8x128xf32>,
    return
  }
  func.func @transform_0(%arg0: i32, %arg1: i32, %arg2: i32) -> (i32, i32) {
    %c1_i32 = arith.constant 1 : i32
    %0 = arith.muli %arg0, %c1_i32 : i32
    %1 = arith.addi %0, %arg2 : i32
    %c0_i32 = arith.constant 0 : i32
    return %arg1, %1 : i32, i32
  }
  func.func @transform_1(%arg0: i32, %arg1: i32, %arg2: i32) -> (i32, i32) {
    %c1_i32 = arith.constant 1 : i32
    %0 = arith.muli %arg0, %c1_i32 : i32
    %1 = arith.addi %0, %arg2 : i32
    %c0_i32 = arith.constant 0 : i32
    return %arg1, %1 : i32, i32
  }
  func.func @transform_2(%arg0: i32, %arg1: i32, %arg2: i32) -> (i32, i32, i32) {
    %c0_i32 = arith.constant 0 : i32
    %c0_i32_0 = arith.constant 0 : i32
    return %arg0, %arg1, %c0_i32 : i32, i32, i32
  }
  func.func @transform_3(%arg0: i32, %arg1: i32, %arg2: i32) -> (i32, i32, i32) {
    %c0_i32 = arith.constant 0 : i32
    %c0_i32_0 = arith.constant 0 : i32
    return %arg0, %arg1, %c0_i32 : i32, i32, i32
  }
  func.func @transform_4(%arg0: i32, %arg1: i32, %arg2: i32) -> (i32, i32, i32) {
    %c0_i32 = arith.constant 0 : i32
    %c0_i32_0 = arith.constant 0 : i32
    return %arg0, %arg1, %c0_i32 : i32, i32, i32
  }
}

</mosaic_0001>

<bundles_post_ra>
// kernel: tpu_custom_call.1
= control target key start
LH: loop header
LB: loop body
LE: loop exit
PB: predicated region body
PF: predicated region fallthrough
CT: control target
= control target key end

     0   :  { %10 = vsyncpa [#allocation3], 0  ;;  %s271_s0 = inlined_call_operand.hbm [shape: f32[8,128], index: 0, kind: input, shape index: {}]   ;;  %s272_s1 = inlined_call_operand.hbm [shape: f32[8,128], index: 1, kind: input, shape index: {}]   ;;  %s273_s2 = inlined_call_operand.hbm [shape: f32[1,8,128], index: 2, kind: output, shape index: {0}]   ;;  %s274_s3 = inlined_call_operand.hbm [shape: f32[1,8,128], index: 3, kind: output, shape index: {1}]   ;;  %s275_s4 = inlined_call_operand.hbm [shape: f32[1,8,128], index: 4, kind: output, shape index: {2}]  }
   0x1   :  { %11 = vsyncpa [#allocation6], 0 }
   0x2   :  { %12 = vsyncpa [#allocation4], 0 }
   0x3   :  { %13 = vsyncpa [#allocation9], 0  ;;  %s226_s15 = smov [#allocation2]   ;;  %s227_s17 = smov [#allocation5]  }
   0x4   :  { %s23_s16 = sshll.u32 %s226_s15, 4  ;;  %s36_s18 = sshll.u32 %s227_s17, 4  ;;  %s24_s16 = int_to_ptr.vmem [resolvable:$true] %s23_s16  ;;  %s37_s18 = int_to_ptr.vmem [resolvable:$true] %s36_s18 }
   0x5   :  { %s126_s19 = scalar_lea.vmem %s24_s16, 128  ;;  %p131_p1 = scmp.lt.s32.totalorder %s24_s16, %s24_s16 }
   0x6   :  { %p127_p0 = scmp.ne.s32.totalorder %s24_s16, %s126_s19  ;;  %p132_p2 = scmp.lt.s32.totalorder %s126_s19, %s126_s19 }
   0x8   :  { %p133_p3 = por %p132_p2, %p131_p1 }
   0xa   :  { %p134_p4 = pnand %p133_p3, %p127_p0 }
   0xc   :  { %137 = shalt.err (!%p134_p4)
}
   0xd   :  { %26 = dma.hbm_to_vmem [thread:$0]  %s271_s0, 128, %s24_s16, [#allocation3]  }
   0xe   :  { %s146_s22 = scalar_lea.vmem %s37_s18, 128  ;;  %p151_p6 = scmp.lt.s32.totalorder %s37_s18, %s37_s18 }
   0xf   :  { %p147_p5 = scmp.ne.s32.totalorder %s37_s18, %s146_s22  ;;  %p152_p7 = scmp.lt.s32.totalorder %s146_s22, %s146_s22 }
  0x11   :  { %p153_p8 = por %p152_p7, %p151_p6 }
  0x13   :  { %p154_p9 = pnand %p153_p8, %p147_p5 }
  0x15   :  { %157 = shalt.err (!%p154_p9)
}
  0x16   :  { %39 = dma.hbm_to_vmem [thread:$0]  %s272_s1, 128, %s37_s18, [#allocation6]  }
  0x17   :  { %218 = dma.done.wait [#allocation3], 128  }
  0x18   :  { %219 = vsyncadd [#allocation3], 4294967168 }
  0x19   :  { %220 = dma.done.wait [#allocation6], 128  }
  0x1a   :  { %221 = vsyncadd [#allocation6], 4294967168  ;;  %s228_s25 = smov [#allocation8]   ;;  %v58_v0 = vld [vmem:[#allocation5] sm:$0xff]  ;;  %v55_v1 = vld [vmem:[#allocation2] sm:$0xff]  ;;  %s229_s0 = smov [#allocation10]  }
  0x1b   :  { %s85_s26 = sshll.u32 %s228_s25, 4  ;;  %v56_v2 = vmax.f32 %v55_v1, 1e-07  ;;  %s95_s27 = sshll.u32 %s229_s0, 4  ;;  %65 = vst [vmem:[#allocation8] sm:$0xff] %v58_v0  ;;  %s86_s26 = int_to_ptr.vmem [resolvable:$true] %s85_s26  ;;  %s96_s27 = int_to_ptr.vmem [resolvable:$true] %s95_s27 }
  0x1c   :  { %s230_s28 = smov [#allocation7]   ;;  %s158_s30 = scalar_lea.vmem %s86_s26, 128 }
  0x1d   :  { %v57_v3 = vmin.f32 %v56_v2, 0.9999999  ;;  %s75_s29 = sshll.u32 %s230_s28, 4  ;;  %p159_p10 = scmp.ne.s32.totalorder %s86_s26, %s158_s30  ;;  %s76_s29 = int_to_ptr.vmem [resolvable:$true] %s75_s29 }
  0x1e   :  { %p163_p11 = scmp.lt.s32.totalorder %s86_s26, %s86_s26  ;;  %p164_p12 = scmp.lt.s32.totalorder %s158_s30, %s158_s30 }
  0x20   :  { %p165_p13 = por %p164_p12, %p163_p11 }
  0x22   :  { %p166_p0 = pnand %p165_p13, %p159_p10 }
  0x24   :  { %169 = shalt.err (!%p166_p0)
}
  0x25   :  { %88 = dma.vmem_to_hbm [thread:$0]  %s86_s26, 128, %s274_s3, [#allocation9]   ;;  %v60_v4 = vmul.f32 %v58_v0, %v57_v3  ;;  %68 = vst [vmem:[#allocation10] sm:$0xff] %v57_v3 }
  0x26   :  { %s178_s6 = scalar_lea.vmem %s96_s27, 128  ;;  %p183_p2 = scmp.lt.s32.totalorder %s96_s27, %s96_s27 }
  0x27   :  { %p179_p1 = scmp.ne.s32.totalorder %s96_s27, %s178_s6  ;;  %p184_p3 = scmp.lt.s32.totalorder %s178_s6, %s178_s6 }
  0x29   :  { %p185_p4 = por %p184_p3, %p183_p2 }
  0x2b   :  { %p186_p5 = pnand %p185_p4, %p179_p1 }
  0x2d   :  { %189 = shalt.err (!%p186_p5)
}
  0x2e   :  { %98 = dma.vmem_to_hbm [thread:$0]  %s96_s27, 128, %s275_s4, [#allocation9]   ;;  %62 = vst [vmem:[#allocation7] sm:$0xff] %v60_v4 }
  0x2f   :  { %s198_s9 = scalar_lea.vmem %s76_s29, 128  ;;  %p203_p7 = scmp.lt.s32.totalorder %s76_s29, %s76_s29 }
  0x30   :  { %p199_p6 = scmp.ne.s32.totalorder %s76_s29, %s198_s9  ;;  %p204_p8 = scmp.lt.s32.totalorder %s198_s9, %s198_s9 }
  0x32   :  { %p205_p9 = por %p204_p8, %p203_p7 }
  0x34   :  { %p206_p10 = pnand %p205_p9, %p199_p6 }
  0x36   :  { %209 = shalt.err (!%p206_p10)
}
  0x37   :  { %78 = dma.vmem_to_hbm [thread:$0]  %s76_s29, 128, %s273_s2, [#allocation4]  }
  0x38   :  { %222 = dma.done.wait [#allocation4], 128  }
  0x39   :  { %223 = vsyncadd [#allocation4], 4294967168 }
  0x3a   :  { %224 = dma.done.wait [#allocation9], 256  }
  0x3b   :  { %225 = vsyncadd [#allocation9], 4294967040 }
  0x3c   :  { %108 = vsyncpa [#allocation3], 1 }
  0x3d   :  { %109 = vsyncpa [#allocation6], 1 }
  0x3e   :  { %110 = vsyncpa [#allocation4], 1 }
  0x3f   :  { %111 = vsyncpa [#allocation9], 1 }

</bundles_post_ra>
